<compile_context>
chip_gen: v5e
topology: v5e:2x2
jax: 0.10.0
libtpu: 0.0.40
codegen_flags: <defaults>
</compile_context>

<pallas_src>
import functools

import jax
import jax.numpy as jnp
from jax import lax
from jax.experimental import pallas as pl
from jax.experimental.pallas import tpu as pltpu


def _dqn_mlp_kernel(x_ref, w1_ref, b1_ref, w2_ref, b2_ref, w3t_ref, b3t_ref, ot_ref):
    mm = w1_ref.dtype  # matmul operand dtype (bf16 fast path or f32 exact path)
    # fc1 + relu: cast x in-kernel; f32 accumulation; elementwise stays f32.
    h1 = jnp.dot(x_ref[...].astype(mm), w1_ref[...], preferred_element_type=jnp.float32)
    h1 = jnp.maximum(h1 + b1_ref[...], 0.0)
    # fc2 + relu
    h2 = jnp.dot(h1.astype(mm), w2_ref[...], preferred_element_type=jnp.float32)
    h2 = jnp.maximum(h2 + b2_ref[...], 0.0)
    # fc3, transposed: (A_pad8, H2) x (TB, H2)^T -> (A_pad8, TB); store is lane-dense.
    out_t = lax.dot_general(
        w3t_ref[...], h2.astype(mm),
        dimension_numbers=(((1,), (1,)), ((), ())),
        preferred_element_type=jnp.float32)
    ot_ref[...] = (out_t + b3t_ref[...]).astype(ot_ref.dtype)


def _round_up(v, m):
    return ((v + m - 1) // m) * m


def prepare_params(params, *, use_bf16=True):
    """One-time weight preparation (call once, reuse across forward calls).

    Returns a dict of device arrays:
      w1 (S,H1) mm_dtype, b1 (1,H1) f32, w2 (H1,H2) mm_dtype, b2 (1,H2) f32,
      w3t (A_pad8,H2) mm_dtype (transposed, zero-padded rows), b3t (A_pad8,1) f32.
    """
    mm_dtype = jnp.bfloat16 if use_bf16 else jnp.float32
    A = params["w3"].shape[1]
    A_pad = _round_up(A, 8)  # sublane-aligned action dim for the transposed output
    w3t = jnp.asarray(params["w3"]).T                     # (A, H2)
    b3t = jnp.asarray(params["b3"]).reshape(A, 1)          # (A, 1)
    if A_pad != A:
        w3t = jnp.pad(w3t, ((0, A_pad - A), (0, 0)))
        b3t = jnp.pad(b3t, ((0, A_pad - A), (0, 0)))
    return {
        "w1": params["w1"].astype(mm_dtype),
        "b1": params["b1"].astype(jnp.float32),
        "w2": params["w2"].astype(mm_dtype),
        "b2": params["b2"].astype(jnp.float32),
        "w3t": w3t.astype(mm_dtype),
        "b3t": b3t.astype(jnp.float32),
    }


@functools.partial(jax.jit, static_argnames=("action_size", "batch_tile"))
def dqn_forward(x, prepped, *, action_size, batch_tile=1024):
    """Fused DQN forward: x (B, S) f32 -> q-values (B, action_size) f32."""
    assert batch_tile % 256 == 0, "batch_tile must be a multiple of 256 (MXU fill)"
    B, S = x.shape
    A_pad = prepped["w3t"].shape[0]

    # --- batch tiling ---
    if B <= batch_tile:
        # Single tile: round to a multiple of 16 (clean bf16 sublane packing).
        TB = _round_up(max(B, 1), 16)
        n_tiles = 1
    else:
        TB = batch_tile
        n_tiles = -(-B // TB)
        if n_tiles % 2:          # even tile count -> balanced v7x megacore split
            n_tiles += 1
    B_pad = n_tiles * TB
    if B_pad != B:
        x = jnp.pad(x, ((0, B_pad - B), (0, 0)))

    # Weights/biases: constant block index -> stay VMEM-resident across batch tiles.
    resident = lambda arr: pl.BlockSpec(arr.shape, lambda i: (0, 0))

    out_t = pl.pallas_call(
        _dqn_mlp_kernel,
        out_shape=jax.ShapeDtypeStruct((A_pad, B_pad), jnp.float32),
        grid=(n_tiles,),
        in_specs=[
            pl.BlockSpec((TB, S), lambda i: (i, 0)),   # x tile: streamed per step (f32)
            resident(prepped["w1"]), resident(prepped["b1"]),
            resident(prepped["w2"]), resident(prepped["b2"]),
            resident(prepped["w3t"]), resident(prepped["b3t"]),
        ],
        # Transposed output: 8 sublanes x TB lanes, disjoint column block per step.
        out_specs=pl.BlockSpec((A_pad, TB), lambda i: (0, i)),
        compiler_params=pltpu.CompilerParams(
            dimension_semantics=("parallel",),  # batch tiles shard across TCs (v7x)
        ),
    )(x, prepped["w1"], prepped["b1"], prepped["w2"], prepped["b2"],
      prepped["w3t"], prepped["b3t"])

    # Tiny slice (8 x B_pad f32) + transpose back to (B, A).
    return out_t[:action_size, :B].T


def init_params(key, state_size, action_size, hidden_dim1=128, hidden_dim2=128):
    """Deterministic init mimicking nn.Linear (uniform in +-1/sqrt(fan_in))."""
    keys = jax.random.split(key, 6)

    def linear(kw, kb, fan_in, fan_out):
        bound = 1.0 / jnp.sqrt(fan_in)
        w = jax.random.uniform(kw, (fan_in, fan_out), jnp.float32, -bound, bound)
        b = jax.random.uniform(kb, (1, fan_out), jnp.float32, -bound, bound)
        return w, b

    w1, b1 = linear(keys[0], keys[1], state_size, hidden_dim1)
    w2, b2 = linear(keys[2], keys[3], hidden_dim1, hidden_dim2)
    w3, b3 = linear(keys[4], keys[5], hidden_dim2, action_size)
    return {"w1": w1, "b1": b1, "w2": w2, "b2": b2, "w3": w3, "b3": b3}


def reference_forward(x, p, mm_dtype=jnp.float32):
    """Pure-JAX reference with the same matmul-operand dtype as the kernel."""
    w1 = p["w1"].astype(mm_dtype)
    w2 = p["w2"].astype(mm_dtype)
    w3 = p["w3"].astype(mm_dtype)
    h1 = jnp.maximum(
        jnp.dot(x.astype(mm_dtype), w1, preferred_element_type=jnp.float32) + p["b1"], 0.0)
    h2 = jnp.maximum(
        jnp.dot(h1.astype(mm_dtype), w2, preferred_element_type=jnp.float32) + p["b2"], 0.0)
    return jnp.dot(h2.astype(mm_dtype), w3, preferred_element_type=jnp.float32) + p["b3"]


if __name__ == "__main__":
    key = jax.random.PRNGKey(0)
    k_param, k_x, k_x2 = jax.random.split(key, 3)

    batch = 2
    state_size = 8       # small observation vector
    action_size = 4      # 4 discrete actions
    hidden1 = 128
    hidden2 = 128

    params = init_params(k_param, state_size, action_size, hidden1, hidden2)
    x = jax.random.normal(k_x, (batch, state_size), jnp.float32)

    # One-time weight preparation (hoisted out of the per-call path).
    prepped_f32 = prepare_params(params, use_bf16=False)
    prepped_bf16 = prepare_params(params, use_bf16=True)

    # 1) f32 matmul path: exact check vs f32 reference.
    out_f32 = jax.block_until_ready(dqn_forward(x, prepped_f32, action_size=action_size))
    ref_f32 = reference_forward(x, params, jnp.float32)
    assert out_f32.shape == (batch, action_size)
    assert jnp.allclose(out_f32, ref_f32, atol=1e-5, rtol=1e-5), "f32 mismatch vs reference"

    # 2) bf16 matmul path (default, fast MXU): check vs bf16-operand reference.
    out_bf16 = jax.block_until_ready(dqn_forward(x, prepped_bf16, action_size=action_size))
    ref_bf16 = reference_forward(x, params, jnp.bfloat16)
    assert out_bf16.shape == (batch, action_size)
    assert jnp.allclose(out_bf16, ref_bf16, atol=2e-2, rtol=2e-2), "bf16 mismatch vs reference"

    # 3) Training-sized batch with a small batch_tile to exercise the multi-tile grid,
    #    the even-tile-count (v7x megacore) path, and padded batch rows:
    #    B=600, batch_tile=256 -> 3 tiles bumped to 4 (B_pad=1024).
    big_batch = 600
    xb = jax.random.normal(k_x2, (big_batch, state_size), jnp.float32)
    out_big = jax.block_until_ready(
        dqn_forward(xb, prepped_bf16, action_size=action_size, batch_tile=256))
    ref_big = reference_forward(xb, params, jnp.bfloat16)
    assert out_big.shape == (big_batch, action_size)
    assert jnp.allclose(out_big, ref_big, atol=2e-2, rtol=2e-2), "batched bf16 mismatch"

    # 4) Same big batch with the default tile (single 608-row tile): exercises the
    #    single-tile path used by typical DQN act()/train() batch sizes.
    out_big2 = jax.block_until_ready(
        dqn_forward(xb, prepped_bf16, action_size=action_size))
    assert jnp.allclose(out_big2, ref_big, atol=2e-2, rtol=2e-2), "single-tile bf16 mismatch"

    print("KERNEL_OK")
</pallas_src>

<mosaic_0001>
module attributes {stable_mosaic.version = 11 : i64} {
  func.func @_dqn_mlp_kernel(%arg0: i32, %arg1: memref<16x8xf32, #tpu.memory_space<vmem>>, %arg2: memref<8x128xf32, #tpu.memory_space<vmem>>, %arg3: memref<1x128xf32, #tpu.memory_space<vmem>>, %arg4: memref<128x128xf32, #tpu.memory_space<vmem>>, %arg5: memref<1x128xf32, #tpu.memory_space<vmem>>, %arg6: memref<8x128xf32, #tpu.memory_space<vmem>>, %arg7: memref<8x1xf32, #tpu.memory_space<vmem>>, %arg8: memref<8x16xf32, #tpu.memory_space<vmem>>) attributes {dimension_semantics = [#tpu.dimension_semantics<parallel>], iteration_bounds = array<i64: 1>, scalar_prefetch = 0 : i64, scratch_operands = 0 : i64, tpu.core_type = #tpu.core_type<tc>, window_params = [{transform_indices = @transform_0, window_bounds = array<i64: 16, 8>}, {pipeline_mode = #tpu.pipeline_mode<synchronous>, transform_indices = @transform_1, window_bounds = array<i64: 8, 128>}, {pipeline_mode = #tpu.pipeline_mode<synchronous>, transform_indices = @transform_2, window_bounds = array<i64: 1, 128>}, {pipeline_mode = #tpu.pipeline_mode<synchronous>, transform_indices = @transform_3, window_bounds = array<i64: 128, 128>}, {pipeline_mode = #tpu.pipeline_mode<synchronous>, transform_indices = @transform_4, window_bounds = array<i64: 1, 128>}, {pipeline_mode = #tpu.pipeline_mode<synchronous>, transform_indices = @transform_5, window_bounds = array<i64: 8, 128>}, {pipeline_mode = #tpu.pipeline_mode<synchronous>, transform_indices = @transform_6, window_bounds = array<i64: 8, 1>}, {transform_indices = @transform_7, window_bounds = array<i64: 8, 16>}]} {
    %c0 = arith.constant 0 : index
    %c0_0 = arith.constant 0 : index
    %0 = vector.load %arg1[%c0, %c0_0] : memref<16x8xf32, #tpu.memory_space<vmem>>, vector<16x8xf32>
    %c0_1 = arith.constant 0 : index
    %c0_2 = arith.constant 0 : index
    %1 = vector.load %arg2[%c0_1, %c0_2] : memref<8x128xf32, #tpu.memory_space<vmem>>, vector<8x128xf32>
    %cst = arith.constant dense<0.000000e+00> : vector<16x128xf32>
    %2 = tpu.matmul %0, %1, %cst {dimension_numbers = #tpu.dot_dimension_numbers<[1], [0], [0], [1], [0, 0, 1, 1], [], []>} : vector<16x8xf32>, vector<8x128xf32>, vector<16x128xf32> -> vector<16x128xf32>
    %c0_3 = arith.constant 0 : index
    %c0_4 = arith.constant 0 : index
    %3 = vector.load %arg3[%c0_3, %c0_4] : memref<1x128xf32, #tpu.memory_space<vmem>>, vector<1x128xf32>
    %4 = vector.broadcast %3 : vector<1x128xf32> to vector<16x128xf32>
    %5 = arith.addf %2, %4 : vector<16x128xf32>
    %cst_5 = arith.constant 0.000000e+00 : f32
    %6 = vector.broadcast %cst_5 : f32 to vector<16x128xf32>
    %7 = arith.maximumf %5, %6 : vector<16x128xf32>
    %c0_6 = arith.constant 0 : index
    %c0_7 = arith.constant 0 : index
    %8 = vector.load %arg4[%c0_6, %c0_7] : memref<128x128xf32, #tpu.memory_space<vmem>>, vector<128x128xf32>
    %cst_8 = arith.constant dense<0.000000e+00> : vector<16x128xf32>
    %9 = tpu.matmul %7, %8, %cst_8 {dimension_numbers = #tpu.dot_dimension_numbers<[1], [0], [0], [1], [0, 0, 1, 1], [], []>} : vector<16x128xf32>, vector<128x128xf32>, vector<16x128xf32> -> vector<16x128xf32>
    %c0_9 = arith.constant 0 : index
    %c0_10 = arith.constant 0 : index
    %10 = vector.load %arg5[%c0_9, %c0_10] : memref<1x128xf32, #tpu.memory_space<vmem>>, vector<1x128xf32>
    %11 = vector.broadcast %10 : vector<1x128xf32> to vector<16x128xf32>
    %12 = arith.addf %9, %11 : vector<16x128xf32>
    %cst_11 = arith.constant 0.000000e+00 : f32
    %13 = vector.broadcast %cst_11 : f32 to vector<16x128xf32>
    %14 = arith.maximumf %12, %13 : vector<16x128xf32>
    %c0_12 = arith.constant 0 : index
    %c0_13 = arith.constant 0 : index
    %15 = vector.load %arg6[%c0_12, %c0_13] : memref<8x128xf32, #tpu.memory_space<vmem>>, vector<8x128xf32>
    %cst_14 = arith.constant dense<0.000000e+00> : vector<8x16xf32>
    %16 = tpu.matmul %15, %14, %cst_14 {dimension_numbers = #tpu.dot_dimension_numbers<[1], [1], [0], [0], [0, 0, 1, 0], [], []>} : vector<8x128xf32>, vector<16x128xf32>, vector<8x16xf32> -> vector<8x16xf32>
    %c0_15 = arith.constant 0 : index
    %c0_16 = arith.constant 0 : index
    %17 = vector.load %arg7[%c0_15, %c0_16] : memref<8x1xf32, #tpu.memory_space<vmem>>, vector<8x1xf32>
    %18 = vector.broadcast %17 : vector<8x1xf32> to vector<8x16xf32>
    %19 = arith.addf %16, %18 : vector<8x16xf32>
    %c0_17 = arith.constant 0 : index
    %c0_18 = arith.constant 0 : index
    %20 = vector.load %arg8[%c0_17, %c0_18] : memref<8x16xf32, #tpu.memory_space<vmem>>, vector<8x16xf32>
    tpu.vector_store %arg8[%c0_17, %c0_18], %19 {strides = array<i32>} : memref<8x16xf32, #tpu.memory_space<vmem>>, vector<8x16xf32>,
    return
  }
  func.func @transform_0(%arg0: i32) -> (i32, i32) {
    %c0_i32 = arith.constant 0 : i32
    %c0_i32_0 = arith.constant 0 : i32
    return %arg0, %c0_i32 : i32, i32
  }
  func.func @transform_1(%arg0: i32) -> (i32, i32) {
    %c0_i32 = arith.constant 0 : i32
    %c0_i32_0 = arith.constant 0 : i32
    %c0_i32_1 = arith.constant 0 : i32
    return %c0_i32, %c0_i32_0 : i32, i32
  }
  func.func @transform_2(%arg0: i32) -> (i32, i32) {
    %c0_i32 = arith.constant 0 : i32
    %c0_i32_0 = arith.constant 0 : i32
    %c0_i32_1 = arith.constant 0 : i32
    return %c0_i32, %c0_i32_0 : i32, i32
  }
  func.func @transform_3(%arg0: i32) -> (i32, i32) {
    %c0_i32 = arith.constant 0 : i32
    %c0_i32_0 = arith.constant 0 : i32
    %c0_i32_1 = arith.constant 0 : i32
    return %c0_i32, %c0_i32_0 : i32, i32
  }
  func.func @transform_4(%arg0: i32) -> (i32, i32) {
    %c0_i32 = arith.constant 0 : i32
    %c0_i32_0 = arith.constant 0 : i32
    %c0_i32_1 = arith.constant 0 : i32
    return %c0_i32, %c0_i32_0 : i32, i32
  }
  func.func @transform_5(%arg0: i32) -> (i32, i32) {
    %c0_i32 = arith.constant 0 : i32
    %c0_i32_0 = arith.constant 0 : i32
    %c0_i32_1 = arith.constant 0 : i32
    return %c0_i32, %c0_i32_0 : i32, i32
  }
  func.func @transform_6(%arg0: i32) -> (i32, i32) {
    %c0_i32 = arith.constant 0 : i32
    %c0_i32_0 = arith.constant 0 : i32
    %c0_i32_1 = arith.constant 0 : i32
    return %c0_i32, %c0_i32_0 : i32, i32
  }
  func.func @transform_7(%arg0: i32) -> (i32, i32) {
    %c0_i32 = arith.constant 0 : i32
    %c0_i32_0 = arith.constant 0 : i32
    return %c0_i32, %arg0 : i32, i32
  }
}

</mosaic_0001>

<bundles_post_ra>
// kernel: dqn_forward.1
= control target key start
LH: loop header
LB: loop body
LE: loop exit
PB: predicated region body
PF: predicated region fallthrough
CT: control target
= control target key end

     0   :  { %12 = vsyncpa [#allocation3], 0  ;;  %s211_s27 = smov [#allocation2]   ;;  %s212_s29 = smov 128   ;;  %s284_s0 = inlined_call_operand.vmem [shape: f32[16,8], index: 0, kind: input, shape index: {}]   ;;  %s285_s1 = inlined_call_operand.vmem [shape: f32[8,128], index: 1, kind: input, shape index: {}]   ;;  %s286_s2 = inlined_call_operand.vmem [shape: f32[1,128], index: 2, kind: input, shape index: {}]   ;;  %s287_s3 = inlined_call_operand.hbm [shape: f32[128,128], index: 3, kind: input, shape index: {}]   ;;  %s288_s4 = inlined_call_operand.vmem [shape: f32[1,128], index: 4, kind: input, shape index: {}]   ;;  %s289_s5 = inlined_call_operand.vmem [shape: f32[8,128], index: 5, kind: input, shape index: {}]   ;;  %s290_s6 = inlined_call_operand.vmem [shape: f32[8,1], index: 6, kind: input, shape index: {}]   ;;  %s291_s7 = inlined_call_operand.vmem [shape: f32[8,16], index: 7, kind: output, shape index: {}]  }
   0x1   :  { %s23_s26 = sshll.u32 %s287_s3, 4  ;;  %s25_s28 = sshll.u32 %s211_s27, 4  ;;  %s24_s26 = int_to_ptr.hbm [resolvable:$true] %s23_s26  ;;  %s26_s28 = int_to_ptr.vmem [resolvable:$true] %s25_s28 }
   0x2   :  { %s213_s30 = smov 8  }
   0x3   :  { %31 = dma.hbm_to_vmem [thread:$0]  %s24_s26, 2048, %s26_s28, [#allocation3], %s212_s29, %s212_s29, %s213_s30  }
   0x4   :  { %209 = dma.done.wait [#allocation3], 2048  }
   0x5   :  { %210 = vsyncadd [#allocation3], 4294965248  ;;  %vm49_vm0 = vcmask 64512   ;;  %v44_v0 = vld [vmem:[%s285_s1] sm:$0xff]  ;;  %v96_v2 = vld [vmem:[#allocation2 + $0x78] sm:$0xff]  ;;  %v214_v27 = vmov 0  }
   0x6   :  { %v42_v1 = vld [vmem:[%s284_s0] sm:$0xff]  ;;  %71 = vmatpush.msra.mxu0 %v44_v0  ;;  %v95_v3 = vld [vmem:[#allocation2 + $0x70] sm:$0xff]  ;;  %101 = vmatpush.msra.mxu1 %v96_v2  ;;  %v94_v4 = vld [vmem:[#allocation2 + $0x68] sm:$0xff]  ;;  %vm153_vm1 = vcmask 130048  }
   0x7   :  { %160 = vmatmul.msk.f32.vlgmr.msra.gmra.mxu0 %vm49_vm0, %v42_v1  ;;  %162 = vmatpush.msra.mxu3 %v96_v2  ;;  %v93_v5 = vld [vmem:[#allocation2 + $0x60] sm:$0xff]  ;;  %v43_v6 = vld [vmem:[%s284_s0 + $0x8] sm:$0xff]  ;;  %v92_v7 = vld [vmem:[#allocation2 + $0x58] sm:$0xff] }
   0x8   :  { %102 = vmatpush.msra.mxu1 %v95_v3  ;;  %v91_v8 = vld [vmem:[#allocation2 + $0x50] sm:$0xff]  ;;  %v90_v9 = vld [vmem:[#allocation2 + $0x48] sm:$0xff]  ;;  %v89_v10 = vld [vmem:[#allocation2 + $0x40] sm:$0xff]  ;;  %182 = vset.pattern.permute.xlu0 %v214_v27 }
   0x9   :  { %163 = vmatpush.msra.mxu3 %v95_v3  ;;  %v88_v11 = vld [vmem:[#allocation2 + $0x38] sm:$0xff]  ;;  %v87_v12 = vld [vmem:[#allocation2 + $0x30] sm:$0xff]  ;;  %v86_v13 = vld [vmem:[#allocation2 + $0x28] sm:$0xff] }
   0xa   :  { %103 = vmatpush.msra.mxu1 %v94_v4  ;;  %v85_v14 = vld [vmem:[#allocation2 + $0x20] sm:$0xff]  ;;  %v84_v15 = vld [vmem:[#allocation2 + $0x18] sm:$0xff]  ;;  %v83_v16 = vld [vmem:[#allocation2 + $0x10] sm:$0xff] }
   0xb   :  { %164 = vmatpush.msra.mxu3 %v94_v4  ;;  %v82_v17 = vld [vmem:[#allocation2 + $0x8] sm:$0xff]  ;;  %v81_v18 = vld [vmem:[#allocation2] sm:$0xff] }
   0xc   :  { %104 = vmatpush.msra.mxu1 %v93_v5  ;;  %v183_v19 = vld [vmem:[%s286_s2] ss:$0 sm:$0xff] }
   0xd   :  { %165 = vmatpush.msra.mxu3 %v93_v5  ;;  %v127_v26 = vld [vmem:[%s290_s6] sm:$0xff] }
   0xe   :  { %105 = vmatpush.msra.mxu1 %v92_v7  ;;  %130 = vperm.xlu0 %182, %v127_v26   ;;  %v184_v28 = vld [vmem:[%s288_s4] ss:$0 sm:$0xff] }
   0xf   :  { %161 = vmatmul.msk.f32.gmra.mxu0 %vm49_vm0, %v43_v6  ;;  %166 = vmatpush.msra.mxu3 %v92_v7  ;;  %v126_v35 = vld [vmem:[%s289_s5] sm:$0xff] }
  0x10   :  { %106 = vmatpush.msra.mxu1 %v91_v8 }
  0x11   :  { %167 = vmatpush.msra.mxu3 %v91_v8 }
  0x12   :  { %107 = vmatpush.msra.mxu1 %v90_v9 }
  0x13   :  { %168 = vmatpush.msra.mxu3 %v90_v9 }
  0x14   :  { %108 = vmatpush.msra.mxu1 %v89_v10 }
  0x15   :  { %169 = vmatpush.msra.mxu3 %v89_v10 }
  0x16   :  { %109 = vmatpush.msra.mxu1 %v88_v11 }
  0x17   :  { %170 = vmatpush.msra.mxu3 %v88_v11 }
  0x18   :  { %110 = vmatpush.msra.mxu1 %v87_v12 }
  0x19   :  { %171 = vmatpush.msra.mxu3 %v87_v12 }
  0x1a   :  { %111 = vmatpush.msra.mxu1 %v86_v13 }
  0x1b   :  { %172 = vmatpush.msra.mxu3 %v86_v13 }
  0x1c   :  { %112 = vmatpush.msra.mxu1 %v85_v14 }
  0x1d   :  { %173 = vmatpush.msra.mxu3 %v85_v14 }
  0x1e   :  { %113 = vmatpush.msra.mxu1 %v84_v15 }
  0x1f   :  { %174 = vmatpush.msra.mxu3 %v84_v15 }
  0x20   :  { %114 = vmatpush.msra.mxu1 %v83_v16 }
  0x21   :  { %175 = vmatpush.msra.mxu3 %v83_v16 }
  0x22   :  { %115 = vmatpush.msra.mxu1 %v82_v17 }
  0x23   :  { %176 = vmatpush.msra.mxu3 %v82_v17 }
  0x24   :  { %116 = vmatpush.msra.mxu1 %v81_v18 }
  0x25   :  { %177 = vmatpush.msra.mxu3 %v81_v18 }
  0x80   :  { %v131_v36 = vpop.permute.xlu0 %130 }
  0x84   :  { %v73_v20 = vpop.f32.mrf.mxu0 }
  0x85   :  { %v74_v21 = vadd.f32 %v183_v19, %v73_v20 }
  0x87   :  { %v79_v22 = vmax.f32 %v74_v21, 0.0 }
  0x89   :  { %117 = vmatmul.f32.vlgmr.msra.gmra.mxu1 %v79_v22 }
  0x8c   :  { %v76_v23 = vpop.f32.mrf.mxu0 }
  0x8d   :  { %v77_v24 = vadd.f32 %v183_v19, %v76_v23 }
  0x8f   :  { %v80_v25 = vmax.f32 %v77_v24, 0.0 }
  0x91   :  { %120 = vmatmul.f32.vlgmr.msra.gmra.mxu3 %v80_v25 }
 0x106   :  { %v118_v29 = vpop.f32.mrf.mxu1 }
 0x107   :  { %v119_v32 = vadd.f32 %v184_v28, %v118_v29 }
 0x109   :  { %v124_v34 = vmax.f32 %v119_v32, 0.0 }
 0x114   :  { %v121_v30 = vpop.f32.mrf.mxu3 }
 0x115   :  { %v122_v31 = vadd.f32 %v184_v28, %v121_v30 }
 0x117   :  { %v125_v33 = vmax.f32 %v122_v31, 0.0 }
 0x119   :  { %147 = vmatpush.xpose.msra.mxu2 %v125_v33 }
 0x11d   :  { %148 = vmatpush.xpose.msra.mxu2 %v124_v34 }
 0x120   :  { %149 = vmatmul.f32.vlgmr.msra.gmra.mxu2 %v126_v35 }
 0x1a3   :  { %v150_v37 = vpop.f32.mrf.mxu2 }
 0x1a4   :  { %v151_v38 = vadd.f32 %v150_v37, %v131_v36 }
 0x1a6   :  { %154 = vst.msk [vmem:[%s291_s7] sm:$0xff] %vm153_vm1, %v151_v38 }
 0x1a7   :  { %159 = vsyncpa [#allocation3], 1 }

</bundles_post_ra>
